<compile_context>
chip_gen: v7x
topology: tpu7x:2x2x1
jax: 0.10.0
libtpu: 0.0.40
codegen_flags: <defaults>
</compile_context>

<pallas_src>
import jax
import jax.numpy as jnp
from jax.experimental import pallas as pl
from jax.experimental.pallas import tpu as pltpu

CLAMP_MIN = -0.07819923456192017
CLAMP_MAX = 0.87295419216156

IC = 3        # conv in-channels
OC = 384      # conv out-channels (lane-dense: 3 x 128)
KH = KW = 2   # kernel size
PAD = 1
STRIDE = 1
C_PAD = 8     # channels zero-padded so each tap contributes 8 lanes
KP = KH * KW * C_PAD   # packed contraction depth = 32


def _round_up(x, m):
    return -(-x // m) * m


def _make_kernel(PW, TR_F, SLAB):
    """Fused conv(2x2, pad=1) + bias + clamp: one (TR_F,32)@(32,384) matmul per block."""
    offs = [kh * PW + kw for kh in range(KH) for kw in range(KW)]   # 0, 1, PW, PW+1

    def kernel(xf_ref, w_ref, b_ref, o_ref):
        # xf_ref: (1, F_pad, C_PAD)  flattened padded image (one batch element)
        # w_ref : (KP, OC)           tap-packed weights
        # b_ref : (1, OC)
        # o_ref : (1, TR_F, OC)      one output block, lane-dense
        i = pl.program_id(1)
        base = pl.multiple_of(i * TR_F, 8)            # TR_F % 8 == 0 -> aligned start
        # One contiguous, sublane-aligned load covering every tap of this block.
        big = xf_ref[0, pl.ds(base, SLAB), :]         # (SLAB, C_PAD)
        # Pack the 4 taps into the contraction dim via static shifts + lane concat.
        lhs = jnp.concatenate([big[off:off + TR_F, :] for off in offs], axis=-1)
        acc = jnp.dot(lhs, w_ref[...], preferred_element_type=jnp.float32)
        acc = acc + b_ref[...]
        acc = jnp.minimum(jnp.maximum(acc, CLAMP_MIN), CLAMP_MAX)
        o_ref[0, :, :] = acc.astype(o_ref.dtype)      # single full aligned store

    return kernel


def prepare_params(weight_oihw, bias):
    """Hoisted once per model: relayout conv params for the kernel."""
    # (OC, IC, KH, KW) -> (KH, KW, IC, OC) -> pad IC -> (KH*KW*C_PAD, OC)
    w = jnp.transpose(weight_oihw, (2, 3, 1, 0))
    w = jnp.pad(w, ((0, 0), (0, 0), (0, C_PAD - IC), (0, 0)))
    w = w.reshape(KP, OC).astype(jnp.float32)
    b = bias.reshape(1, OC).astype(jnp.float32)
    return w, b


@jax.jit
def conv2d_clamp_nhwc(x_nchw, w_packed, bias_row):
    """Conv + clamp; returns channels-last (N, OH, OW, OC) — the fast lane-dense path."""
    N, C, H, W = x_nchw.shape
    OH = (H + 2 * PAD - KH) // STRIDE + 1
    OW = (W + 2 * PAD - KW) // STRIDE + 1
    PH, PW = H + 2 * PAD, W + 2 * PAD          # note: PW == OW + 1 (flat-row trick)
    NB = 2 if N == 1 else 1                    # 2 balanced blocks for batch 1 (v7x)
    M_img = OH * PW                            # flat output rows per image (incl. seam col)
    TR_F = _round_up(-(-M_img // NB), 8)       # flat rows per block, multiple of 8
    SLAB = _round_up(TR_F + (KH - 1) * PW + (KW - 1), 8)
    F_pad = max((NB - 1) * TR_F + SLAB, PH * PW)

    # Tiny XLA-side glue: NCHW -> padded NHWC -> flatten rows -> pad tail with zeros.
    x_nhwc = jnp.transpose(x_nchw, (0, 2, 3, 1)).astype(jnp.float32)
    xp = jnp.pad(x_nhwc, ((0, 0), (PAD, PAD), (PAD, PAD), (0, C_PAD - C)))
    xf = xp.reshape(N, PH * PW, C_PAD)
    xf = jnp.pad(xf, ((0, 0), (0, F_pad - PH * PW), (0, 0)))

    cost = pl.CostEstimate(
        flops=2 * N * OH * OW * KH * KW * C * OC,
        transcendentals=0,
        bytes_accessed=4 * (N * F_pad * C_PAD + KP * OC + OC + N * NB * TR_F * OC),
    )

    out3 = pl.pallas_call(
        _make_kernel(PW, TR_F, SLAB),
        out_shape=jax.ShapeDtypeStruct((N, NB * TR_F, OC), jnp.float32),
        grid=(N, NB),
        in_specs=[
            pl.BlockSpec((1, F_pad, C_PAD), lambda n, i: (n, 0, 0)),
            pl.BlockSpec((KP, OC), lambda n, i: (0, 0)),
            pl.BlockSpec((1, OC), lambda n, i: (0, 0)),
        ],
        out_specs=pl.BlockSpec((1, TR_F, OC), lambda n, i: (n, i, 0)),
        compiler_params=pltpu.CompilerParams(
            dimension_semantics=("parallel", "parallel")),
        cost_estimate=cost,
    )(xf, w_packed, bias_row)

    # Drop padded tail rows and the one garbage "seam" column per row; NHWC out.
    out = out3[:, :M_img].reshape(N, OH, PW, OC)[:, :, :OW]
    return out


@jax.jit
def conv2d_clamp(x_nchw, w_packed, bias_row):
    """Module-equivalent output layout (NCHW). Prefer conv2d_clamp_nhwc when the
    consumer accepts channels-last: it avoids the final relayout transpose."""
    return jnp.transpose(conv2d_clamp_nhwc(x_nchw, w_packed, bias_row), (0, 3, 1, 2))


def _reference(x_nchw, weight_oihw, bias):
    y = jax.lax.conv_general_dilated(
        x_nchw, weight_oihw,
        window_strides=(STRIDE, STRIDE),
        padding=((PAD, PAD), (PAD, PAD)),
        dimension_numbers=("NCHW", "OIHW", "NCHW"),
    )
    y = y + bias.reshape(1, OC, 1, 1)
    return jnp.clip(y, CLAMP_MIN, CLAMP_MAX)


if __name__ == "__main__":
    key = jax.random.PRNGKey(0)
    kx, kwt, kb = jax.random.split(key, 3)

    H = Wd = 16
    x = jax.random.normal(kx, (1, IC, H, Wd), dtype=jnp.float32)

    # Deterministic parameter init (mimics Conv2d default uniform bound)
    fan_in = IC * KH * KW
    bound = 1.0 / (fan_in ** 0.5)
    weight = jax.random.uniform(kwt, (OC, IC, KH, KW), minval=-bound, maxval=bound,
                                dtype=jnp.float32)
    bias = jax.random.uniform(kb, (OC,), minval=-bound, maxval=bound,
                              dtype=jnp.float32)

    w_packed, bias_row = prepare_params(weight, bias)   # hoisted param relayout (once)

    out = jax.block_until_ready(conv2d_clamp(x, w_packed, bias_row))
    ref = jax.block_until_ready(_reference(x, weight, bias))

    assert out.shape == (1, OC, H + 1, Wd + 1), out.shape
    assert jnp.allclose(out, ref, atol=1e-4, rtol=1e-4), "mismatch vs reference"

    # Fast-path sanity check (channels-last output, no final NCHW relayout).
    out_nhwc = jax.block_until_ready(conv2d_clamp_nhwc(x, w_packed, bias_row))
    assert out_nhwc.shape == (1, H + 1, Wd + 1, OC)
    assert jnp.allclose(out_nhwc, jnp.transpose(ref, (0, 2, 3, 1)),
                        atol=1e-4, rtol=1e-4), "nhwc mismatch vs reference"

    print("KERNEL_OK")
</pallas_src>

<mosaic_0001>
module attributes {stable_mosaic.version = 11 : i64} {
  func.func @kernel(%arg0: i32, %arg1: i32, %arg2: memref<1x344x8xf32, #tpu.memory_space<vmem>>, %arg3: memref<32x384xf32, #tpu.memory_space<vmem>>, %arg4: memref<1x384xf32, #tpu.memory_space<vmem>>, %arg5: memref<1x160x384xf32, #tpu.memory_space<vmem>>) attributes {dimension_semantics = [#tpu.dimension_semantics<parallel>, #tpu.dimension_semantics<parallel>], iteration_bounds = array<i64: 1, 2>, scalar_prefetch = 0 : i64, scratch_operands = 0 : i64, tpu.core_type = #tpu.core_type<tc>, window_params = [{transform_indices = @transform_0, window_bounds = array<i64: 1, 344, 8>}, {pipeline_mode = #tpu.pipeline_mode<synchronous>, transform_indices = @transform_1, window_bounds = array<i64: 32, 384>}, {pipeline_mode = #tpu.pipeline_mode<synchronous>, transform_indices = @transform_2, window_bounds = array<i64: 1, 384>}, {transform_indices = @transform_3, window_bounds = array<i64: 1, 160, 384>}]} {
    %c160_i32 = arith.constant 160 : i32
    %0 = arith.muli %arg1, %c160_i32 : i32
    %1 = tpu.assume_multiple %0, 8 : i32
    %c0 = arith.constant 0 : index
    %2 = arith.index_cast %1 : i32 to index
    %c0_0 = arith.constant 0 : index
    %3 = vector.load %arg2[%c0, %2, %c0_0] : memref<1x344x8xf32, #tpu.memory_space<vmem>>, vector<1x184x8xf32>
    %4 = vector.shape_cast %3 : vector<1x184x8xf32> to vector<184x8xf32>
    %5 = vector.extract_strided_slice %4 {offsets = [0, 0], sizes = [160, 8], strides = [1, 1]} : vector<184x8xf32> to vector<160x8xf32>
    %6 = vector.extract_strided_slice %4 {offsets = [1, 0], sizes = [160, 8], strides = [1, 1]} : vector<184x8xf32> to vector<160x8xf32>
    %7 = vector.extract_strided_slice %4 {offsets = [18, 0], sizes = [160, 8], strides = [1, 1]} : vector<184x8xf32> to vector<160x8xf32>
    %8 = vector.extract_strided_slice %4 {offsets = [19, 0], sizes = [160, 8], strides = [1, 1]} : vector<184x8xf32> to vector<160x8xf32>
    %9 = tpu.concatenate %5, %6, %7, %8 in 1 : vector<160x8xf32>, vector<160x8xf32>, vector<160x8xf32>, vector<160x8xf32> -> vector<160x32xf32>
    %c0_1 = arith.constant 0 : index
    %c0_2 = arith.constant 0 : index
    %10 = vector.load %arg3[%c0_1, %c0_2] : memref<32x384xf32, #tpu.memory_space<vmem>>, vector<32x384xf32>
    %cst = arith.constant dense<0.000000e+00> : vector<160x384xf32>
    %11 = tpu.matmul %9, %10, %cst {dimension_numbers = #tpu.dot_dimension_numbers<[1], [0], [0], [1], [0, 0, 1, 1], [], []>} : vector<160x32xf32>, vector<32x384xf32>, vector<160x384xf32> -> vector<160x384xf32>
    %c0_3 = arith.constant 0 : index
    %c0_4 = arith.constant 0 : index
    %12 = vector.load %arg4[%c0_3, %c0_4] : memref<1x384xf32, #tpu.memory_space<vmem>>, vector<1x384xf32>
    %13 = vector.broadcast %12 : vector<1x384xf32> to vector<160x384xf32>
    %14 = arith.addf %11, %13 : vector<160x384xf32>
    %cst_5 = arith.constant -0.0781992375 : f32
    %15 = vector.broadcast %cst_5 : f32 to vector<160x384xf32>
    %16 = arith.maximumf %14, %15 : vector<160x384xf32>
    %cst_6 = arith.constant 0.872954189 : f32
    %17 = vector.broadcast %cst_6 : f32 to vector<160x384xf32>
    %18 = arith.minimumf %16, %17 : vector<160x384xf32>
    %c0_7 = arith.constant 0 : index
    %c0_8 = arith.constant 0 : index
    %c0_9 = arith.constant 0 : index
    %19 = vector.load %arg5[%c0_7, %c0_8, %c0_9] : memref<1x160x384xf32, #tpu.memory_space<vmem>>, vector<1x160x384xf32>
    %20 = vector.shape_cast %19 : vector<1x160x384xf32> to vector<160x384xf32>
    %21 = vector.shape_cast %18 : vector<160x384xf32> to vector<1x160x384xf32>
    tpu.vector_store %arg5[%c0_7, %c0_8, %c0_9], %21 {strides = array<i32>} : memref<1x160x384xf32, #tpu.memory_space<vmem>>, vector<1x160x384xf32>,
    return
  }
  func.func @transform_0(%arg0: i32, %arg1: i32) -> (i32, i32, i32) {
    %c0_i32 = arith.constant 0 : i32
    %c0_i32_0 = arith.constant 0 : i32
    %c0_i32_1 = arith.constant 0 : i32
    return %arg0, %c0_i32, %c0_i32_0 : i32, i32, i32
  }
  func.func @transform_1(%arg0: i32, %arg1: i32) -> (i32, i32) {
    %c0_i32 = arith.constant 0 : i32
    %c0_i32_0 = arith.constant 0 : i32
    %c0_i32_1 = arith.constant 0 : i32
    return %c0_i32, %c0_i32_0 : i32, i32
  }
  func.func @transform_2(%arg0: i32, %arg1: i32) -> (i32, i32) {
    %c0_i32 = arith.constant 0 : i32
    %c0_i32_0 = arith.constant 0 : i32
    %c0_i32_1 = arith.constant 0 : i32
    return %c0_i32, %c0_i32_0 : i32, i32
  }
  func.func @transform_3(%arg0: i32, %arg1: i32) -> (i32, i32, i32) {
    %c0_i32 = arith.constant 0 : i32
    %c0_i32_0 = arith.constant 0 : i32
    return %arg0, %arg1, %c0_i32 : i32, i32, i32
  }
}

</mosaic_0001>

<bundles_post_ra>
// kernel: conv2d_clamp_nhwc.1
= control target key start
LH: loop header
LB: loop body
LE: loop exit
PB: predicated region body
PF: predicated region fallthrough
CT: control target
= control target key end

     0   :  { %s1532_s12 = smov 0   ;;  %s1534_s13 = smov 0   ;;  %s2184_s0 = inlined_call_operand.vmem [shape: f32[1,344,8], index: 0, kind: input, shape index: {}]   ;;  %s2185_s1 = inlined_call_operand.vmem [shape: f32[32,384], index: 1, kind: input, shape index: {}]   ;;  %s2186_s2 = inlined_call_operand.vmem [shape: f32[1,384], index: 2, kind: input, shape index: {}]   ;;  %s2187_s3 = inlined_call_operand.vmem [shape: f32[1,320,384], index: 3, kind: output, shape index: {}]  }
   0x1   :  { %s1536_s14 = smov 0  }
   0x2 LB: > { %s22_s15 = sadd.s32 1, %s1502_s13  ;;  %p1329_p0 = scmp.ge.s32.totalorder %s1506_s14, 1  ;;  %s1506_s14 = sphi %s1536_s14, %s13_s14   ;;  %s1502_s13 = sphi %s1534_s13, %s2189_s13   ;;  %s1498_s12 = sphi %s1532_s12, %s2188_s12  }
   0x3   : > { %p23_p1 = scmp.ge.s32.totalorder %s22_s15, 2  ;;  %p151_p2 = scmp.lt.s32.totalorder %s1506_s14, 3 }
   0x5   : > { %s2191_s15 = smov (%p23_p1, %s22_s15), 0  ;;  %p152_p3 = pnand %p1329_p0, %p151_p2 }
   0x6   : > { %s196_s16 = smul.u32 (!%p152_p3), 160, %s1498_s12  ;;  %v614_v0 = vld [vmem:[%s2185_s1 + $0x8] sm:$0xff] (!%p152_p3)  ;;  %v617_v1 = vld [vmem:[%s2185_s1 + $0x20] sm:$0xff] (!%p152_p3)  ;;  %v616_v4 = vld [vmem:[%s2185_s1 + $0x18] sm:$0xff] (!%p152_p3)  ;;  %vm346_vm0 = vcmask (!%p152_p3), 1045504   ;;  %vm242_vm1 = vcmask (!%p152_p3), 1046528  }
   0x7   : > { %155 = sbr.rel (%p152_p3) target bundleno = 476 (0x1dc), region = 32  ;;  %v613_v2 = vld [vmem:[%s2185_s1] sm:$0xff] (!%p152_p3)  ;;  %v1435_v3 = vpack.c.bf16 (!%p152_p3), %v617_v1, %v614_v0  ;;  %v620_v5 = vld [vmem:[%s2185_s1 + $0x38] sm:$0xff] (!%p152_p3)  ;;  %v623_v6 = vld [vmem:[%s2185_s1 + $0x50] sm:$0xff] (!%p152_p3)  ;;  %v1508_v12 = vmov (!%p152_p3), 0.0   ;;  %s1509_s5 = smov (!%p152_p3), 16  }
   0x8   : > { %s1565_s25 = scalar_lea.vmem (!%p152_p3), %s2184_s0, %s196_s16  ;;  %v1437_v10 = vpack.c.bf16 (!%p152_p3), %v616_v4, %v613_v2  ;;  %v1439_v11 = vpack.c.bf16 (!%p152_p3), %v623_v6, %v620_v5  ;;  %767 = vmatprep.mubr.f32.mxu0 (!%p152_p3), %v1508_v12  ;;  %857 = vmatprep.mubr.f32.mxu1 (!%p152_p3), %v1508_v12  ;;  %s1510_s6 = smov (!%p152_p3), 8   ;;  %vm448_vm2 = vcmask (!%p152_p3), 1044480   ;;  %v619_v59 = vld [vmem:[%s2185_s1 + $0x30] sm:$0xff] (!%p152_p3)  ;;  %v622_v60 = vld [vmem:[%s2185_s1 + $0x48] sm:$0xff] (!%p152_p3)  ;;  %vm550_vm3 = vcmask (!%p152_p3), 64512  }
   0x9   : > { %v1577_v7 = vld [vmem:[%s1565_s25 + $0x10] sm:$0xff] (!%p152_p3)  ;;  %v1580_v8 = vld [vmem:[%s1565_s25 + $0x18] sm:$0xff] (!%p152_p3)  ;;  %v1583_v9 = vld [vmem:[%s1565_s25] sm:$0xff] (!%p152_p3)  ;;  %1436 = vmatprep.subr.bf16.mxu0 (!%p152_p3), %v1435_v3  ;;  %1451 = vmatprep.subr.bf16.mxu1 (!%p152_p3), %v1435_v3  ;;  %s1511_s7 = smov (!%p152_p3), 24   ;;  %v1441_v5 = vpack.c.bf16 (!%p152_p3), %v622_v60, %v619_v59  ;;  %vm571_vm4 = vcmask (!%p152_p3), 130048   ;;  %vm592_vm5 = vcmask (!%p152_p3), 195584  }
   0xa   : > { %v347_v13 = vrot.slane (!%p152_p3), %v1577_v7, 2  ;;  %v348_v14 = vrot.slane (!%p152_p3), %v1580_v8, 2  ;;  %v1590_v15 = vld [vmem:[%s1565_s25 + $0x8] sm:$0xff] (!%p152_p3)  ;;  %v243_v16 = vrot.slane (!%p152_p3), %v1583_v9, 1  ;;  %v1597_v18 = vld [vmem:[%s1565_s25 + $0x90] sm:$0xff] (!%p152_p3)  ;;  %v1603_v22 = vld [vmem:[%s1565_s25 + $0x78] sm:$0xff] (!%p152_p3)  ;;  %1438 = vmatpush1.bf16.msra.mxu0 (!%p152_p3), %v1437_v10  ;;  %1453 = vmatpush1.bf16.msra.mxu1 (!%p152_p3), %v1437_v10 }
   0xb   : > { %v1594_v17 = vld [vmem:[%s1565_s25 + $0x88] sm:$0xff] (!%p152_p3)  ;;  %v244_v19 = vrot.slane (!%p152_p3), %v1590_v15, 1  ;;  %v378_v21 = vrot.slane (!%p152_p3), %v1597_v18, 2  ;;  %v1606_v23 = vld [vmem:[%s1565_s25 + $0x80] sm:$0xff] (!%p152_p3)  ;;  %v272_v25 = vrot.slane (!%p152_p3), %v1603_v22, 1  ;;  %1440 = vmatprep.subr.bf16.mxu0 (!%p152_p3), %v1439_v11  ;;  %1452 = vmatprep.subr.bf16.mxu1 (!%p152_p3), %v1439_v11  ;;  %v480_v30 = vrot.slane (!%p152_p3), %v1597_v18, 3 }
   0xc   : > { %v376_v20 = vrot.slane (!%p152_p3), %v1594_v17, 2  ;;  %v349_v24 = vsel (!%p152_p3), %vm346_vm0, %v347_v13, %v348_v14  ;;  %v274_v26 = vrot.slane (!%p152_p3), %v1606_v23, 1  ;;  %v478_v29 = vrot.slane (!%p152_p3), %v1594_v17, 3  ;;  %v1631_v38 = vld [vmem:[%s1565_s25 + $0x98] sm:$0xff] (!%p152_p3)  ;;  %v1634_v39 = vld [vmem:[%s1565_s25 + $0x20] sm:$0xff] (!%p152_p3)  ;;  %v1656_v53 = vld [vmem:[%s1565_s25 + $0x28] sm:$0xff] (!%p152_p3) }
   0xd   : > { %388 = vrot.lane.b32.xlu1 (!%p152_p3), %v349_v24, %s1509_s5  ;;  %v245_v27 = vsel (!%p152_p3), %vm242_vm1, %v243_v16, %v244_v19  ;;  %v449_v32 = vrot.slane (!%p152_p3), %v1577_v7, 3  ;;  %v450_v33 = vrot.slane (!%p152_p3), %v1580_v8, 3  ;;  %v276_v35 = vrot.slane (!%p152_p3), %v1594_v17, 1  ;;  %v218_v52 = vld [vmem:[%s1565_s25 + $0xa0] sm:$0xff] (!%p152_p3)  ;;  %v1664_v58 = vld [vmem:[%s1565_s25 + $0x70] sm:$0xff] (!%p152_p3)  ;;  %s185_s24 = smul.u32 (!%p152_p3), 20, %s1498_s12 }
   0xe   : > { %284 = vrot.lane.b32.xlu0 %v245_v27, %s1510_s6  ;;  %v379_v28 = vsel %vm346_vm0, %v376_v20, %v378_v21  ;;  %v275_v31 = vsel %vm242_vm1, %v272_v25, %v274_v26  ;;  %v481_v34 = vsel %vm448_vm2, %v478_v29, %v480_v30  ;;  %v246_v37 = vrot.slane %v1577_v7, 1  ;;  %1442 = vmatpush1.bf16.msra.mxu0 %v1441_v5 }
   0xf   : > { %v451_v36 = vsel %vm448_vm2, %v449_v32, %v450_v33  ;;  %v277_v40 = vsel %vm242_vm1, %v274_v26, %v276_v35  ;;  %v380_v41 = vrot.slane %v1631_v38, 2  ;;  %v350_v43 = vrot.slane %v1634_v39, 2  ;;  %1454 = vmatpush1.bf16.msra.mxu1 %v1441_v5  ;;  %v618_v32 = vld [vmem:[%s2185_s1 + $0x28] sm:$0xff]  ;;  %p188_p4 = scmp.lt.s32.totalorder %s185_s24, 39 }
  0x10   : > { %v247_v42 = vsel %vm242_vm1, %v244_v19, %v246_v37  ;;  %v482_v45 = vrot.slane %v1631_v38, 3  ;;  %v452_v47 = vrot.slane %v1634_v39, 3  ;;  %v278_v49 = vrot.slane %v1597_v18, 1  ;;  %v219_v19 = vld [vmem:[%s1565_s25 + $0xa8] sm:$0xff] }
  0x11   : > { %418 = vrot.lane.b32.xlu1 %v379_v28, %s1509_s5  ;;  %v381_v44 = vsel %vm346_vm0, %v378_v21, %v380_v41  ;;  %v351_v46 = vsel %vm346_vm0, %v348_v14, %v350_v43  ;;  %v248_v51 = vrot.slane %v1580_v8, 1  ;;  %v382_v55 = vrot.slane %v218_v52, 2  ;;  %s2193_s24 = smov (!%p188_p4, %s185_s24), 39 }
  0x12   : > { %314 = vrot.lane.b32.xlu0 %v275_v31, %s1510_s6  ;;  %v483_v48 = vsel %vm448_vm2, %v480_v30, %v482_v45  ;;  %v453_v50 = vsel %vm448_vm2, %v450_v33, %v452_v47  ;;  %v279_v54 = vsel %vm242_vm1, %v276_v35, %v278_v49  ;;  %v352_v57 = vrot.slane %v1656_v53, 2  ;;  %v615_v31 = vld [vmem:[%s2185_s1 + $0x10] sm:$0xff]  ;;  %s1455_s12 = smul.u32 24, %s2193_s24 }
  0x13   : > { %v249_v56 = vsel %vm242_vm1, %v246_v37, %v248_v51  ;;  %v270_v61 = vrot.slane %v1664_v58, 1  ;;  %v383_v62 = vsel %vm346_vm0, %v380_v41, %v382_v55  ;;  %v484_v63 = vrot.slane %v218_v52, 3  ;;  %v1735_v41 = vld [vmem:[%s1565_s25 + $0x38] sm:$0xff] }
  0x14   : > { %v454_v0 = vrot.slane %v1656_v53, 3  ;;  %v374_v1 = vrot.slane %v1606_v23, 2  ;;  %v353_v2 = vsel %vm346_vm0, %v350_v43, %v352_v57  ;;  %v476_v3 = vrot.slane %v1606_v23, 3  ;;  %s2053_s29 = scalar_lea.vmem %s2187_s3, %s1455_s12 }
  0x15   : > { %520 = vrot.lane.b32.xlu1 %v481_v34, %s1511_s7  ;;  %v1685_v4 = vsel %vm242_vm1, %v270_v61, %v272_v25  ;;  %v485_v11 = vsel %vm448_vm2, %v482_v45, %v484_v63  ;;  %v280_v13 = vrot.slane %v1631_v38, 1  ;;  %v250_v16 = vrot.slane %v1634_v39, 1 }
  0x16   : > { %490 = vrot.lane.b32.xlu0 %v451_v36, %s1511_s7  ;;  %v1692_v6 = vsel %vm346_vm0, %v374_v1, %v376_v20  ;;  %v1698_v10 = vsel %vm448_vm2, %v476_v3, %v478_v29  ;;  %v455_v14 = vsel %vm448_vm2, %v452_v47, %v454_v0  ;;  %v1707_v20 = vld [vmem:[%s1565_s25 + $0x30] sm:$0xff]  ;;  %v384_v24 = vrot.slane %v219_v19, 2 }
  0x17   : > { %v281_v21 = vsel %vm242_vm1, %v278_v49, %v280_v13  ;;  %v251_v25 = vsel %vm242_vm1, %v248_v51, %v250_v16  ;;  %v354_v26 = vrot.slane %v1707_v20, 2  ;;  %v486_v28 = vrot.slane %v219_v19, 3 }
  0x18   : > { %v385_v27 = vsel %vm346_vm0, %v382_v55, %v384_v24  ;;  %v456_v30 = vrot.slane %v1707_v20, 3  ;;  %v1725_v33 = vpack.c.bf16 %v618_v32, %v615_v31  ;;  %v282_v35 = vrot.slane %v218_v52, 1  ;;  %v1796_v32 = vld [vmem:[%s1565_s25 + $0x60] sm:$0xff] }
  0x19   : > { %316 = vrot.lane.b32.xlu1 %v277_v40, %s1510_s6  ;;  %v355_v29 = vsel %vm346_vm0, %v352_v57, %v354_v26  ;;  %v487_v34 = vsel %vm448_vm2, %v484_v63, %v486_v28  ;;  %v252_v37 = vrot.slane %v1656_v53, 1  ;;  %v220_v40 = vld [vmem:[%s1565_s25 + $0xb0] sm:$0xff]  ;;  %v356_v45 = vrot.slane %v1735_v41, 2 }
  0x1a   : > { %286 = vrot.lane.b32.xlu0 %v247_v42, %s1510_s6  ;;  %1444 = vmatprep.subr.bf16.mxu1 %v1725_v33  ;;  %v457_v36 = vsel %vm448_vm2, %v454_v0, %v456_v30  ;;  %v283_v42 = vsel %vm242_vm1, %v280_v13, %v282_v35  ;;  %v386_v43 = vrot.slane %v220_v40, 2  ;;  %v488_v47 = vrot.slane %v220_v40, 3 }
  0x1b   : > { %v458_v49 = vrot.slane %v1735_v41, 3  ;;  %v254_v55 = vrot.slane %v1707_v20, 1  ;;  %v256_v57 = vrot.slane %v1735_v41, 1  ;;  %v366_v35 = vrot.slane %v1796_v32, 2 }
  0x1c   : > { %v489_v51 = vsel %vm448_vm2, %v486_v28, %v488_v47  ;;  %vm642_vm6 = vcmask 261120  }
  0x1d   : > { %420 = vrot.lane.b32.xlu1 %v381_v44, %s1509_s5  ;;  %v253_v44 = vsel %vm242_vm1, %v250_v16, %v252_v37  ;;  %v255_v59 = vsel %vm242_vm1, %v252_v37, %v254_v55  ;;  %v257_v63 = vsel %vm242_vm1, %v254_v55, %v256_v57  ;;  %v370_v55 = vrot.slane %v1664_v58, 2 }
  0x1e   : > { %390 = vrot.lane.b32.xlu0 %v351_v46, %s1509_s5  ;;  %v387_v46 = vsel %vm346_vm0, %v384_v24, %v386_v43 }
  0x21   : > { %522 = vrot.lane.b32.xlu1 %v483_v48, %s1511_s7  ;;  %v357_v48 = vsel %vm346_vm0, %v354_v26, %v356_v45 }
  0x22   : > { %492 = vrot.lane.b32.xlu0 %v453_v50, %s1511_s7  ;;  %v1748_v50 = vld [vmem:[%s1565_s25 + $0x40] sm:$0xff] }
  0x23   : > { %v358_v52 = vrot.slane %v1748_v50, 2  ;;  %v460_v60 = vrot.slane %v1748_v50, 3  ;;  %v258_v19 = vrot.slane %v1748_v50, 1 }
  0x25   : > { %318 = vrot.lane.b32.xlu1 %v279_v54, %s1510_s6  ;;  %v459_v54 = vsel %vm448_vm2, %v456_v30, %v458_v49 }
  0x26   : > { %288 = vrot.lane.b32.xlu0 %v249_v56, %s1510_s6  ;;  %v359_v56 = vsel %vm346_vm0, %v356_v45, %v358_v52  ;;  %v1811_v45 = vld [vmem:[%s1565_s25 + $0x68] sm:$0xff] }
  0x27   : > { %v368_v47 = vrot.slane %v1811_v45, 2 }
  0x29   : > { %422 = vrot.lane.b32.xlu1 %v383_v62, %s1509_s5  ;;  %v1763_v62 = vld [vmem:[%s1565_s25 + $0x48] sm:$0xff] }
  0x2a   : > { %392 = vrot.lane.b32.xlu0 %v353_v2, %s1509_s5  ;;  %v462_v0 = vrot.slane %v1763_v62, 3  ;;  %v461_v2 = vsel %vm448_vm2, %v458_v49, %v460_v60  ;;  %v360_v5 = vrot.slane %v1763_v62, 2  ;;  %v260_v24 = vrot.slane %v1763_v62, 1 }
  0x2b   : > { %v266_v49 = vrot.slane %v1796_v32, 1 }
  0x2c   : > { %v463_v13 = vsel %vm448_vm2, %v460_v60, %v462_v0  ;;  %v361_v16 = vsel %vm346_vm0, %v358_v52, %v360_v5  ;;  %v261_v28 = vsel %vm242_vm1, %v258_v19, %v260_v24  ;;  %v470_v52 = vrot.slane %v1811_v45, 3 }
  0x2d   : > { %524 = vrot.lane.b32.xlu1 %v485_v11, %s1511_s7  ;;  %v1772_v11 = vld [vmem:[%s1565_s25 + $0x50] sm:$0xff]  ;;  %v472_v60 = vrot.slane %v1664_v58, 3 }
  0x2e   : > { %494 = vrot.lane.b32.xlu0 %v455_v14, %s1511_s7  ;;  %v362_v14 = vrot.slane %v1772_v11, 2  ;;  %v464_v26 = vrot.slane %v1772_v11, 3  ;;  %v262_v37 = vrot.slane %v1772_v11, 1 }
  0x30   : > { %v465_v30 = vsel %vm448_vm2, %v462_v0, %v464_v26  ;;  %v263_v43 = vsel %vm242_vm1, %v260_v24, %v262_v37  ;;  %v372_v0 = vrot.slane %v1603_v22, 2 }
  0x31   : > { %320 = vrot.lane.b32.xlu1 %v281_v21, %s1510_s6  ;;  %v363_v21 = vsel %vm346_vm0, %v360_v5, %v362_v14 }
  0x32   : > { %290 = vrot.lane.b32.xlu0 %v251_v25, %s1510_s6  ;;  %v259_v25 = vsel %vm242_vm1, %v256_v57, %v258_v19  ;;  %v268_v57 = vrot.slane %v1811_v45, 1  ;;  %v373_v5 = vsel %vm346_vm0, %v370_v55, %v372_v0  ;;  %v375_v19 = vsel %vm346_vm0, %v372_v0, %v374_v1 }
  0x35   : > { %424 = vrot.lane.b32.xlu1 %v385_v27, %s1509_s5  ;;  %v1787_v27 = vld [vmem:[%s1565_s25 + $0x58] sm:$0xff] }
  0x36   : > { %394 = vrot.lane.b32.xlu0 %v355_v29, %s1509_s5  ;;  %v466_v29 = vrot.slane %v1787_v27, 3  ;;  %v364_v31 = vrot.slane %v1787_v27, 2 }
  0x38   : > { %v367_v40 = vsel %vm346_vm0, %v364_v31, %v366_v35 }
  0x39   : > { %526 = vrot.lane.b32.xlu1 %v487_v34, %s1511_s7  ;;  %v467_v34 = vsel %vm448_vm2, %v464_v26, %v466_v29 }
  0x3a   : > { %496 = vrot.lane.b32.xlu0 %v457_v36, %s1511_s7  ;;  %v365_v36 = vsel %vm346_vm0, %v362_v14, %v364_v31  ;;  %v271_v14 = vsel %vm242_vm1, %v268_v57, %v270_v61 }
  0x3d   : > { %322 = vrot.lane.b32.xlu1 %v283_v42, %s1510_s6  ;;  %v264_v42 = vrot.slane %v1787_v27, 1 }
  0x3e   : > { %292 = vrot.lane.b32.xlu0 %v253_v44, %s1510_s6  ;;  %v468_v44 = vrot.slane %v1796_v32, 3 }
  0x41   : > { %426 = vrot.lane.b32.xlu1 %v387_v46, %s1509_s5  ;;  %v265_v46 = vsel %vm242_vm1, %v262_v37, %v264_v42 }
  0x42   : > { %396 = vrot.lane.b32.xlu0 %v357_v48, %s1509_s5  ;;  %v469_v48 = vsel %vm448_vm2, %v466_v29, %v468_v44 }
  0x45   : > { %528 = vrot.lane.b32.xlu1 %v489_v51, %s1511_s7  ;;  %v369_v51 = vsel %vm346_vm0, %v366_v35, %v368_v47 }
  0x46   : > { %498 = vrot.lane.b32.xlu0 %v459_v54, %s1511_s7  ;;  %v267_v54 = vsel %vm242_vm1, %v264_v42, %v266_v49 }
  0x49   : > { %398 = vrot.lane.b32.xlu1 %v359_v56, %s1509_s5  ;;  %v471_v56 = vsel %vm448_vm2, %v468_v44, %v470_v52 }
  0x4a   : > { %294 = vrot.lane.b32.xlu0 %v255_v59, %s1510_s6  ;;  %v371_v59 = vsel %vm346_vm0, %v368_v47, %v370_v55 }
  0x4d   : > { %296 = vrot.lane.b32.xlu1 %v257_v63, %s1510_s6  ;;  %v269_v63 = vsel %vm242_vm1, %v266_v49, %v268_v57 }
  0x4e   : > { %500 = vrot.lane.b32.xlu0 %v461_v2, %s1511_s7  ;;  %v473_v2 = vsel %vm448_vm2, %v470_v52, %v472_v60 }
  0x51   : > { %502 = vrot.lane.b32.xlu1 %v463_v13, %s1511_s7  ;;  %v474_v13 = vrot.slane %v1603_v22, 3 }
  0x52   : > { %400 = vrot.lane.b32.xlu0 %v361_v16, %s1509_s5 }
  0x53   : > { %v475_v16 = vsel %vm448_vm2, %v472_v60, %v474_v13 }
  0x55   : > { %402 = vrot.lane.b32.xlu1 %v363_v21, %s1509_s5  ;;  %v477_v21 = vsel %vm448_vm2, %v474_v13, %v476_v3 }
  0x56   : > { %298 = vrot.lane.b32.xlu0 %v259_v25, %s1510_s6 }
  0x59   : > { %300 = vrot.lane.b32.xlu1 %v261_v28, %s1510_s6 }
  0x5a   : > { %504 = vrot.lane.b32.xlu0 %v465_v30, %s1511_s7 }
  0x5d   : > { %506 = vrot.lane.b32.xlu1 %v467_v34, %s1511_s7 }
  0x5e   : > { %404 = vrot.lane.b32.xlu0 %v365_v36, %s1509_s5 }
  0x61   : > { %406 = vrot.lane.b32.xlu1 %v367_v40, %s1509_s5 }
  0x62   : > { %302 = vrot.lane.b32.xlu0 %v263_v43, %s1510_s6 }
  0x65   : > { %304 = vrot.lane.b32.xlu1 %v265_v46, %s1510_s6 }
  0x66   : > { %508 = vrot.lane.b32.xlu0 %v469_v48, %s1511_s7 }
  0x69   : > { %408 = vrot.lane.b32.xlu1 %v369_v51, %s1509_s5 }
  0x6a   : > { %306 = vrot.lane.b32.xlu0 %v267_v54, %s1510_s6 }
  0x6d   : > { %510 = vrot.lane.b32.xlu1 %v471_v56, %s1511_s7 }
  0x6e   : > { %410 = vrot.lane.b32.xlu0 %v371_v59, %s1509_s5 }
  0x71   : > { %308 = vrot.lane.b32.xlu1 %v269_v63, %s1510_s6 }
  0x72   : > { %512 = vrot.lane.b32.xlu0 %v473_v2, %s1511_s7 }
  0x75   : > { %412 = vrot.lane.b32.xlu1 %v373_v5, %s1509_s5 }
  0x76   : > { %310 = vrot.lane.b32.xlu0 %v271_v14, %s1510_s6 }
  0x79   : > { %514 = vrot.lane.b32.xlu1 %v475_v16, %s1511_s7 }
  0x7a   : > { %414 = vrot.lane.b32.xlu0 %v375_v19, %s1509_s5 }
  0x7d   : > { %312 = vrot.lane.b32.xlu1 %v1685_v4, %s1510_s6  ;;  %v621_v4 = vld [vmem:[%s2185_s1 + $0x40] sm:$0xff] }
  0x7e   : > { %516 = vrot.lane.b32.xlu0 %v477_v21, %s1511_s7 }
  0x7f   : > { %v389_v61 = vpop.permute.xlu1 %388 }
  0x80   : > { %v285_v24 = vpop.permute.xlu0 %284 }
  0x81   : > { %518 = vrot.lane.b32.xlu1 %v1698_v10, %s1511_s7  ;;  %v551_v26 = vsel %vm550_vm3, %v1583_v9, %v285_v24  ;;  %v624_v10 = vld [vmem:[%s2185_s1 + $0x58] sm:$0xff] }
  0x82   : > { %416 = vrot.lane.b32.xlu0 %v1692_v6, %s1509_s5  ;;  %v572_v9 = vsel %vm571_vm4, %v551_v26, %v389_v61  ;;  %v1447_v30 = vpack.c.bf16 %v624_v10, %v621_v4 }
  0x83   : > { %v419_v1 = vpop.permute.xlu1 %418 }
  0x84   : > { %v315_v25 = vpop.permute.xlu0 %314 }
  0x85   : > { %v566_v3 = vsel %vm550_vm3, %v1603_v22, %v315_v25 }
  0x86   : > { %v587_v28 = vsel %vm571_vm4, %v566_v3, %v419_v1 }
  0x87   : > { %v521_v6 = vpop.permute.xlu1 %520 }
  0x88   : > { %v1873_v29 = vsel %vm592_vm5, %v587_v28, %v521_v6  ;;  %v491_v22 = vpop.permute.xlu0 %490 }
  0x89   : > { %v1877_v31 = vsel %vm592_vm5, %v572_v9, %v491_v22  ;;  %1346 = vmatmul.mubr.msk.f32.vlgmr.msra.gmra.mrb[0].mxu1 %vm642_vm6, %v1873_v29 }
  0x8a   : > { %1331 = vmatmul.mubr.msk.f32.vlgmr.msra.gmra.mrb[0].mxu0 %vm642_vm6, %v1877_v31  ;;  %863 = vmatprep.mubr.f32.mxu1 %v1508_v12 }
  0x8b   : > { %v317_v34 = vpop.permute.xlu1 %316  ;;  %773 = vmatprep.mubr.f32.mxu0 %v1508_v12  ;;  %1446 = vmatpush3.bf16.msra.mxu1 %v1725_v33 }
  0x8c   : > { %v287_v35 = vpop.permute.xlu0 %286  ;;  %1448 = vmatprep.subr.bf16.mxu1 %v1447_v30  ;;  %v567_v40 = vsel %vm550_vm3, %v1606_v23, %v317_v34 }
  0x8d   : > { %v552_v42 = vsel %vm550_vm3, %v1590_v15, %v287_v35 }
  0x8f   : > { %v421_v36 = vpop.permute.xlu1 %420  ;;  %1450 = vmatpush3.bf16.msra.mxu1 %v1447_v30 }
  0x90   : > { %v391_v37 = vpop.permute.xlu0 %390  ;;  %v588_v43 = vsel %vm571_vm4, %v567_v40, %v421_v36 }
  0x91   : > { %v573_v46 = vsel %vm571_vm4, %v552_v42, %v391_v37 }
  0x93   : > { %v523_v44 = vpop.permute.xlu1 %522 }
  0x94   : > { %v1893_v47 = vsel %vm592_vm5, %v588_v43, %v523_v44  ;;  %v493_v33 = vpop.permute.xlu0 %492 }
  0x95   : > { %v594_v48 = vsel %vm592_vm5, %v573_v46, %v493_v33  ;;  %1347 = vmatmul.mubr.msk.f32.gmra.mrb[2].mxu1 %vm642_vm6, %v1893_v47 }
  0x96   : > { %1332 = vmatmul.mubr.msk.f32.gmra.mrb[2].mxu0 %vm642_vm6, %v594_v48  ;;  %869 = vmatprep.mubr.f32.mxu1 %v1508_v12 }
  0x97   : > { %v319_v23 = vpop.permute.xlu1 %318  ;;  %779 = vmatprep.mubr.f32.mxu0 %v1508_v12 }
  0x98   : > { %v289_v15 = vpop.permute.xlu0 %288  ;;  %v568_v52 = vsel %vm550_vm3, %v1594_v17, %v319_v23 }
  0x99   : > { %v553_v54 = vsel %vm550_vm3, %v1577_v7, %v289_v15 }
  0x9b   : > { %v423_v49 = vpop.permute.xlu1 %422 }
  0x9c   : > { %v393_v51 = vpop.permute.xlu0 %392  ;;  %v589_v55 = vsel %vm571_vm4, %v568_v52, %v423_v49 }
  0x9d   : > { %v574_v57 = vsel %vm571_vm4, %v553_v54, %v393_v51 }
  0x9f   : > { %v525_v56 = vpop.permute.xlu1 %524 }
  0xa0   : > { %v1908_v59 = vsel %vm592_vm5, %v589_v55, %v525_v56  ;;  %v495_v60 = vpop.permute.xlu0 %494 }
  0xa1   : > { %v595_v63 = vsel %vm592_vm5, %v574_v57, %v495_v60  ;;  %1348 = vmatmul.mubr.msk.f32.gmra.mrb[4].mxu1 %vm642_vm6, %v1908_v59 }
  0xa2   : > { %1333 = vmatmul.mubr.msk.f32.gmra.mrb[4].mxu0 %vm642_vm6, %v595_v63  ;;  %875 = vmatprep.mubr.f32.mxu1 %v1508_v12 }
  0xa3   : > { %v321_v17 = vpop.permute.xlu1 %320  ;;  %785 = vmatprep.mubr.f32.mxu0 %v1508_v12 }
  0xa4   : > { %v291_v7 = vpop.permute.xlu0 %290  ;;  %v569_v5 = vsel %vm550_vm3, %v1597_v18, %v321_v17 }
  0xa5   : > { %v554_v13 = vsel %vm550_vm3, %v1580_v8, %v291_v7 }
  0xa7   : > { %v425_v0 = vpop.permute.xlu1 %424 }
  0xa8   : > { %v395_v2 = vpop.permute.xlu0 %394  ;;  %v590_v14 = vsel %vm571_vm4, %v569_v5, %v425_v0 }
  0xa9   : > { %v575_v19 = vsel %vm571_vm4, %v554_v13, %v395_v2 }
  0xab   : > { %v527_v16 = vpop.permute.xlu1 %526 }
  0xac   : > { %v1923_v21 = vsel %vm592_vm5, %v590_v14, %v527_v16  ;;  %v497_v61 = vpop.permute.xlu0 %496 }
  0xad   : > { %v596_v24 = vsel %vm592_vm5, %v575_v19, %v497_v61  ;;  %1349 = vmatmul.mubr.msk.f32.gmra.mrb[6].mxu1 %vm642_vm6, %v1923_v21 }
  0xae   : > { %1334 = vmatmul.mubr.msk.f32.gmra.mrb[6].mxu0 %vm642_vm6, %v596_v24  ;;  %881 = vmatprep.mubr.f32.mxu1 %v1508_v12 }
  0xaf   : > { %v323_v18 = vpop.permute.xlu1 %322  ;;  %791 = vmatprep.mubr.f32.mxu0 %v1508_v12 }
  0xb0   : > { %v293_v8 = vpop.permute.xlu0 %292  ;;  %v570_v26 = vsel %vm550_vm3, %v1631_v38, %v323_v18 }
  0xb1   : > { %v555_v3 = vsel %vm550_vm3, %v1634_v39, %v293_v8 }
  0xb3   : > { %v427_v1 = vpop.permute.xlu1 %426 }
  0xb4   : > { %v397_v25 = vpop.permute.xlu0 %396  ;;  %v591_v4 = vsel %vm571_vm4, %v570_v26, %v427_v1 }
  0xb5   : > { %v576_v6 = vsel %vm571_vm4, %v555_v3, %v397_v25 }
  0xb7   : > { %v529_v10 = vpop.permute.xlu1 %528 }
  0xb8   : > { %v1938_v28 = vsel %vm592_vm5, %v591_v4, %v529_v10  ;;  %v499_v9 = vpop.permute.xlu0 %498 }
  0xb9   : > { %v597_v22 = vsel %vm592_vm5, %v576_v6, %v499_v9  ;;  %1350 = vmatmul.mubr.msk.f32.gmra.mrb[8].mxu1 %vm642_vm6, %v1938_v28 }
  0xba   : > { %1335 = vmatmul.mubr.msk.f32.gmra.mrb[8].mxu0 %vm642_vm6, %v597_v22  ;;  %1405 = vmatprep.mubr.msk.f32.mxu1 %vm642_vm6, %v1877_v31 }
  0xbb   : > { %v399_v38 = vpop.permute.xlu1 %398  ;;  %797 = vmatprep.mubr.f32.mxu0 %v1508_v12 }
  0xbc   : > { %v295_v39 = vpop.permute.xlu0 %294 }
  0xbd   : > { %v556_v30 = vsel %vm550_vm3, %v1656_v53, %v295_v39  ;;  %1406 = vmatmul.mubr.msk.f32.vlgmr.msra.gmra.mrb[10].mxu1 %vm642_vm6, %v594_v48 }
  0xbe   : > { %1408 = vmatprep.mubr.msk.f32.mxu1 %vm642_vm6, %v595_v63  ;;  %v577_v35 = vsel %vm571_vm4, %v556_v30, %v399_v38 }
  0xbf   : > { %v297_v34 = vpop.permute.xlu1 %296 }
  0xc0   : > { %v501_v36 = vpop.permute.xlu0 %500  ;;  %v557_v53 = vsel %vm550_vm3, %v1707_v20, %v297_v34 }
  0xc1   : > { %v598_v37 = vsel %vm592_vm5, %v577_v35, %v501_v36  ;;  %1409 = vmatmul.mubr.msk.f32.gmra.mrb[12].mxu1 %vm642_vm6, %v596_v24 }
  0xc2   : > { %1336 = vmatmul.mubr.msk.f32.gmra.mrb[10].mxu0 %vm642_vm6, %v598_v37  ;;  %1411 = vmatprep.mubr.msk.f32.mxu1 %vm642_vm6, %v597_v22 }
  0xc3   : > { %v503_v31 = vpop.permute.xlu1 %502  ;;  %803 = vmatprep.mubr.f32.mxu0 %v1508_v12 }
  0xc4   : > { %v401_v40 = vpop.permute.xlu0 %400 }
  0xc5   : > { %v578_v42 = vsel %vm571_vm4, %v557_v53, %v401_v40  ;;  %1412 = vmatmul.mubr.msk.f32.gmra.mrb[14].mxu1 %vm642_vm6, %v598_v37 }
  0xc6   : > { %v599_v43 = vsel %vm592_vm5, %v578_v42, %v503_v31 }
  0xc7   : > { %1337 = vmatmul.mubr.msk.f32.gmra.mrb[12].mxu0 %vm642_vm6, %v599_v43  ;;  %1414 = vmatprep.mubr.msk.f32.mxu1 %vm642_vm6, %v599_v43  ;;  %v403_v44 = vpop.permute.xlu1 %402 }
  0xc8   : > { %v299_v46 = vpop.permute.xlu0 %298  ;;  %809 = vmatprep.mubr.f32.mxu0 %v1508_v12 }
  0xc9   : > { %v558_v33 = vsel %vm550_vm3, %v1735_v41, %v299_v46 }
  0xca   : > { %v579_v20 = vsel %vm571_vm4, %v558_v33, %v403_v44 }
  0xcb   : > { %v301_v48 = vpop.permute.xlu1 %300 }
  0xcc   : > { %v505_v23 = vpop.permute.xlu0 %504  ;;  %v559_v51 = vsel %vm550_vm3, %v1748_v50, %v301_v48 }
  0xcd   : > { %v600_v15 = vsel %vm592_vm5, %v579_v20, %v505_v23 }
  0xce   : > { %1338 = vmatmul.mubr.msk.f32.gmra.mrb[14].mxu0 %vm642_vm6, %v600_v15  ;;  %1415 = vmatmul.mubr.msk.f32.gmra.mrb[16].mxu1 %vm642_vm6, %v600_v15 }
  0xcf   : > { %v507_v49 = vpop.permute.xlu1 %506  ;;  %815 = vmatprep.mubr.f32.mxu0 %v1508_v12 }
  0xd0   : > { %v405_v52 = vpop.permute.xlu0 %404 }
  0xd1   : > { %v580_v54 = vsel %vm571_vm4, %v559_v51, %v405_v52 }
  0xd2   : > { %v601_v41 = vsel %vm592_vm5, %v580_v54, %v507_v49 }
  0xd3   : > { %1339 = vmatmul.mubr.msk.f32.gmra.mrb[16].mxu0 %vm642_vm6, %v601_v41  ;;  %1417 = vmatprep.mubr.msk.f32.mxu1 %vm642_vm6, %v601_v41  ;;  %v407_v55 = vpop.permute.xlu1 %406 }
  0xd4   : > { %v303_v56 = vpop.permute.xlu0 %302  ;;  %821 = vmatprep.mubr.f32.mxu0 %v1508_v12 }
  0xd5   : > { %v560_v57 = vsel %vm550_vm3, %v1763_v62, %v303_v56 }
  0xd6   : > { %v581_v63 = vsel %vm571_vm4, %v560_v57, %v407_v55 }
  0xd7   : > { %v305_v60 = vpop.permute.xlu1 %304 }
  0xd8   : > { %v509_v50 = vpop.permute.xlu0 %508  ;;  %v561_v2 = vsel %vm550_vm3, %v1772_v11, %v305_v60 }
  0xd9   : > { %v602_v17 = vsel %vm592_vm5, %v581_v63, %v509_v50 }
  0xda   : > { %1340 = vmatmul.mubr.msk.f32.gmra.mrb[18].mxu0 %vm642_vm6, %v602_v17  ;;  %1418 = vmatmul.mubr.msk.f32.gmra.mrb[18].mxu1 %vm642_vm6, %v602_v17 }
  0xdb   : > { %v409_v7 = vpop.permute.xlu1 %408  ;;  %827 = vmatprep.mubr.f32.mxu0 %v1508_v12 }
  0xdc   : > { %v307_v0 = vpop.permute.xlu0 %306  ;;  %v582_v5 = vsel %vm571_vm4, %v561_v2, %v409_v7 }
  0xdd   : > { %v562_v16 = vsel %vm550_vm3, %v1787_v27, %v307_v0 }
  0xdf   : > { %v511_v62 = vpop.permute.xlu1 %510 }
  0xe0   : > { %v603_v13 = vsel %vm592_vm5, %v582_v5, %v511_v62  ;;  %v411_v14 = vpop.permute.xlu0 %410 }
  0xe1   : > { %1341 = vmatmul.mubr.msk.f32.gmra.mrb[20].mxu0 %vm642_vm6, %v603_v13  ;;  %1420 = vmatprep.mubr.msk.f32.mxu1 %vm642_vm6, %v603_v13  ;;  %v583_v61 = vsel %vm571_vm4, %v562_v16, %v411_v14 }
  0xe2   : > { %833 = vmatprep.mubr.f32.mxu0 %v1508_v12 }
  0xe3   : > { %v309_v19 = vpop.permute.xlu1 %308 }
  0xe4   : > { %v513_v24 = vpop.permute.xlu0 %512  ;;  %v563_v1 = vsel %vm550_vm3, %v1796_v32, %v309_v19 }
  0xe5   : > { %v604_v11 = vsel %vm592_vm5, %v583_v61, %v513_v24 }
  0xe6   : > { %1342 = vmatmul.mubr.msk.f32.gmra.mrb[22].mxu0 %vm642_vm6, %v604_v11  ;;  %1421 = vmatmul.mubr.msk.f32.gmra.mrb[20].mxu1 %vm642_vm6, %v604_v11 }
  0xe7   : > { %v413_v18 = vpop.permute.xlu1 %412  ;;  %839 = vmatprep.mubr.f32.mxu0 %v1508_v12 }
  0xe8   : > { %v311_v8 = vpop.permute.xlu0 %310  ;;  %v584_v25 = vsel %vm571_vm4, %v563_v1, %v413_v18 }
  0xe9   : > { %v564_v4 = vsel %vm550_vm3, %v1811_v45, %v311_v8 }
  0xeb   : > { %v515_v27 = vpop.permute.xlu1 %514 }
  0xec   : > { %v605_v26 = vsel %vm592_vm5, %v584_v25, %v515_v27  ;;  %v415_v3 = vpop.permute.xlu0 %414 }
  0xed   : > { %1343 = vmatmul.mubr.msk.f32.gmra.mrb[24].mxu0 %vm642_vm6, %v605_v26  ;;  %1423 = vmatprep.mubr.msk.f32.mxu1 %vm642_vm6, %v605_v26  ;;  %v585_v6 = vsel %vm571_vm4, %v564_v4, %v415_v3 }
  0xee   : > { %845 = vmatprep.mubr.f32.mxu0 %v1508_v12 }
  0xef   : > { %v313_v10 = vpop.permute.xlu1 %312 }
  0xf0   : > { %v517_v9 = vpop.permute.xlu0 %516  ;;  %v565_v38 = vsel %vm550_vm3, %v1664_v58, %v313_v10 }
  0xf1   : > { %v606_v32 = vsel %vm592_vm5, %v585_v6, %v517_v9 }
  0xf2   : > { %1344 = vmatmul.mubr.msk.f32.gmra.mrb[26].mxu0 %vm642_vm6, %v606_v32  ;;  %1424 = vmatmul.mubr.msk.f32.gmra.mrb[22].mxu1 %vm642_vm6, %v606_v32 }
  0xf3   : > { %v519_v22 = vpop.permute.xlu1 %518  ;;  %851 = vmatprep.mubr.f32.mxu0 %v1508_v12  ;;  %v627_v12 = vlaneseq }
  0xf4   : > { %v417_v39 = vpop.permute.xlu0 %416 }
  0xf5   : > { %v586_v45 = vsel %vm571_vm4, %v565_v38, %v417_v39  ;;  %v2031_v58 = vshrl.u32 %v627_v12, 7 }
  0xf6   : > { %v607_v30 = vsel %vm592_vm5, %v586_v45, %v519_v22 }
  0xf7   : > { %1345 = vmatmul.mubr.msk.f32.gmra.mrb[28].mxu0 %vm642_vm6, %v607_v30  ;;  %1426 = vmatprep.mubr.msk.f32.mxu1 %vm642_vm6, %v607_v30  ;;  %v629_v34 = vsub.s32 0, %v2031_v58 }
  0xf8   : > { %1427 = vmatmul.mubr.msk.f32.gmra.mrb[24].mxu1 %vm642_vm6, %v1873_v29  ;;  %v2037_v29 = vld [vmem:[%s2186_s2] sm:$0x7] }
  0xf9   : > { %1429 = vmatprep.mubr.msk.f32.mxu1 %vm642_vm6, %v1893_v47  ;;  %v633_v47 = vsub.s32 1, %v2031_v58 }
  0xfc   : > { %1430 = vmatmul.mubr.msk.f32.gmra.mrb[26].mxu1 %vm642_vm6, %v1908_v59  ;;  %v2041_v59 = vrot.slane %v2037_v29, %v629_v34 }
  0xfd   : > { %1432 = vmatprep.mubr.msk.f32.mxu1 %vm642_vm6, %v1923_v21  ;;  %v2044_v21 = vrot.slane %v2037_v29, %v633_v47 }
 0x100   : > { %1433 = vmatmul.mubr.msk.f32.gmra.mrb[28].mxu1 %vm642_vm6, %v1938_v28 }
 0x15c   : > { %v859_v28 = vpop.f32.mrb[0].mxu1 }
 0x15d   : > { %v769_v35 = vpop.f32.mrb[0].mxu0  ;;  %v860_v36 = vadd.f32 %v859_v28, %v2041_v59  ;;  %v861_v37 = vpop.f32.mrb[1].mxu1 }
 0x15e   : > { %v770_v31 = vadd.f32 %v769_v35, %v2041_v59  ;;  %v771_v53 = vpop.f32.mrb[1].mxu0  ;;  %v862_v40 = vadd.f32 %v861_v37, %v2044_v21 }
 0x15f   : > { %v1098_v42 = vmax.f32 %v860_v36, -0.07819924  ;;  %v772_v43 = vadd.f32 %v771_v53, %v2044_v21 }
 0x160   : > { %v1053_v44 = vmax.f32 %v770_v31, -0.07819924  ;;  %v1099_v46 = vmax.f32 %v862_v40, -0.07819924  ;;  %v637_v31 = vsub.s32 2, %v2031_v58 }
 0x161   : > { %v1158_v33 = vmin.f32 %v1098_v42, 0.8729542  ;;  %v1054_v48 = vmax.f32 %v772_v43, -0.07819924 }
 0x162   : > { %v1113_v20 = vmin.f32 %v1053_v44, 0.8729542  ;;  %v1159_v23 = vmin.f32 %v1099_v46, 0.8729542  ;;  %v2086_v44 = vrot.slane %v2037_v29, %v637_v31 }
 0x163   : > { %1218 = vst [vmem:[%s2053_s29 + $0x168] sm:$0xff] %v1158_v33  ;;  %v1114_v15 = vmin.f32 %v1054_v48, 0.8729542 }
 0x164   : > { %1173 = vst [vmem:[%s2053_s29] sm:$0xff] %v1113_v20  ;;  %1219 = vst [vmem:[%s2053_s29 + $0x170] sm:$0xff] %v1159_v23 }
 0x165   : > { %1174 = vst [vmem:[%s2053_s29 + $0x8] sm:$0xff] %v1114_v15 }
 0x168   : > { %v865_v49 = vpop.f32.mrb[2].mxu1 }
 0x169   : > { %v775_v51 = vpop.f32.mrb[2].mxu0  ;;  %v866_v52 = vadd.f32 %v865_v49, %v2041_v59  ;;  %v867_v54 = vpop.f32.mrb[3].mxu1 }
 0x16a   : > { %v776_v41 = vadd.f32 %v775_v51, %v2041_v59  ;;  %v777_v55 = vpop.f32.mrb[3].mxu0  ;;  %v868_v56 = vadd.f32 %v867_v54, %v2044_v21 }
 0x16b   : > { %v1101_v57 = vmax.f32 %v866_v52, -0.07819924  ;;  %v778_v60 = vadd.f32 %v777_v55, %v2044_v21 }
 0x16c   : > { %v1056_v63 = vmax.f32 %v776_v41, -0.07819924  ;;  %v1102_v50 = vmax.f32 %v868_v56, -0.07819924 }
 0x16d   : > { %v1161_v17 = vmin.f32 %v1101_v57, 0.8729542  ;;  %v1057_v7 = vmax.f32 %v778_v60, -0.07819924 }
 0x16e   : > { %v1116_v0 = vmin.f32 %v1056_v63, 0.8729542  ;;  %v1162_v2 = vmin.f32 %v1102_v50, 0.8729542 }
 0x16f   : > { %1221 = vst [vmem:[%s2053_s29 + $0x180] sm:$0xff] %v1161_v17  ;;  %v1117_v5 = vmin.f32 %v1057_v7, 0.8729542 }
 0x170   : > { %1176 = vst [vmem:[%s2053_s29 + $0x18] sm:$0xff] %v1116_v0  ;;  %1222 = vst [vmem:[%s2053_s29 + $0x188] sm:$0xff] %v1162_v2 }
 0x171   : > { %1177 = vst [vmem:[%s2053_s29 + $0x20] sm:$0xff] %v1117_v5 }
 0x174   : > { %v871_v62 = vpop.f32.mrb[4].mxu1 }
 0x175   : > { %v781_v13 = vpop.f32.mrb[4].mxu0  ;;  %v872_v14 = vadd.f32 %v871_v62, %v2041_v59  ;;  %v873_v16 = vpop.f32.mrb[5].mxu1 }
 0x176   : > { %v782_v19 = vadd.f32 %v781_v13, %v2041_v59  ;;  %v783_v61 = vpop.f32.mrb[5].mxu0  ;;  %v874_v24 = vadd.f32 %v873_v16, %v2044_v21 }
 0x177   : > { %v1104_v11 = vmax.f32 %v872_v14, -0.07819924  ;;  %v784_v18 = vadd.f32 %v783_v61, %v2044_v21 }
 0x178   : > { %v1059_v8 = vmax.f32 %v782_v19, -0.07819924  ;;  %v1105_v1 = vmax.f32 %v874_v24, -0.07819924 }
 0x179   : > { %v1164_v25 = vmin.f32 %v1104_v11, 0.8729542  ;;  %v1060_v27 = vmax.f32 %v784_v18, -0.07819924 }
 0x17a   : > { %v1119_v26 = vmin.f32 %v1059_v8, 0.8729542  ;;  %v1165_v3 = vmin.f32 %v1105_v1, 0.8729542 }
 0x17b   : > { %1224 = vst [vmem:[%s2053_s29 + $0x198] sm:$0xff] %v1164_v25  ;;  %v1120_v4 = vmin.f32 %v1060_v27, 0.8729542 }
 0x17c   : > { %1179 = vst [vmem:[%s2053_s29 + $0x30] sm:$0xff] %v1119_v26  ;;  %1225 = vst [vmem:[%s2053_s29 + $0x1a0] sm:$0xff] %v1165_v3 }
 0x17d   : > { %1180 = vst [vmem:[%s2053_s29 + $0x38] sm:$0xff] %v1120_v4 }
 0x180   : > { %v877_v10 = vpop.f32.mrb[6].mxu1 }
 0x181   : > { %v787_v6 = vpop.f32.mrb[6].mxu0  ;;  %v878_v9 = vadd.f32 %v877_v10, %v2041_v59  ;;  %v879_v32 = vpop.f32.mrb[7].mxu1 }
 0x182   : > { %v788_v22 = vadd.f32 %v787_v6, %v2041_v59  ;;  %v789_v38 = vpop.f32.mrb[7].mxu0  ;;  %v880_v39 = vadd.f32 %v879_v32, %v2044_v21 }
 0x183   : > { %v1107_v45 = vmax.f32 %v878_v9, -0.07819924  ;;  %v790_v30 = vadd.f32 %v789_v38, %v2044_v21 }
 0x184   : > { %v1062_v12 = vmax.f32 %v788_v22, -0.07819924  ;;  %v1108_v34 = vmax.f32 %v880_v39, -0.07819924 }
 0x185   : > { %v1167_v47 = vmin.f32 %v1107_v45, 0.8729542  ;;  %v1063_v28 = vmax.f32 %v790_v30, -0.07819924 }
 0x186   : > { %v1122_v35 = vmin.f32 %v1062_v12, 0.8729542  ;;  %v1168_v36 = vmin.f32 %v1108_v34, 0.8729542 }
 0x187   : > { %1227 = vst [vmem:[%s2053_s29 + $0x1b0] sm:$0xff] %v1167_v47  ;;  %v1123_v37 = vmin.f32 %v1063_v28, 0.8729542 }
 0x188   : > { %1182 = vst [vmem:[%s2053_s29 + $0x48] sm:$0xff] %v1122_v35  ;;  %1228 = vst [vmem:[%s2053_s29 + $0x1b8] sm:$0xff] %v1168_v36 }
 0x189   : > { %1183 = vst [vmem:[%s2053_s29 + $0x50] sm:$0xff] %v1123_v37 }
 0x18c   : > { %v883_v53 = vpop.f32.mrb[8].mxu1 }
 0x18d   : > { %v793_v40 = vpop.f32.mrb[8].mxu0  ;;  %v884_v42 = vadd.f32 %v883_v53, %v2041_v59  ;;  %v885_v43 = vpop.f32.mrb[9].mxu1 }
 0x18e   : > { %v794_v46 = vadd.f32 %v793_v40, %v2041_v59  ;;  %v795_v33 = vpop.f32.mrb[9].mxu0  ;;  %v886_v48 = vadd.f32 %v885_v43, %v2044_v21 }
 0x18f   : > { %v1110_v20 = vmax.f32 %v884_v42, -0.07819924  ;;  %v796_v23 = vadd.f32 %v795_v33, %v2044_v21 }
 0x190   : > { %v1065_v58 = vmax.f32 %v794_v46, -0.07819924  ;;  %v1111_v15 = vmax.f32 %v886_v48, -0.07819924  ;;  %v1407_v49 = vpop.f32.mrb[10].mxu1 }
 0x191   : > { %v1170_v51 = vmin.f32 %v1110_v20, 0.8729542  ;;  %v1066_v52 = vmax.f32 %v796_v23, -0.07819924  ;;  %v960_v29 = vadd.f32 %v1407_v49, %v2086_v44  ;;  %v954_v54 = vpop.f32.mrb[11].mxu1 }
 0x192   : > { %v1125_v41 = vmin.f32 %v1065_v58, 0.8729542  ;;  %v1171_v55 = vmin.f32 %v1111_v15, 0.8729542  ;;  %v955_v56 = vadd.f32 %v954_v54, %v2086_v44 }
 0x193   : > { %1230 = vst [vmem:[%s2053_s29 + $0x1c8] sm:$0xff] %v1170_v51  ;;  %v1126_v57 = vmin.f32 %v1066_v52, 0.8729542  ;;  %v1058_v60 = vmax.f32 %v960_v29, -0.07819924 }
 0x194   : > { %1185 = vst [vmem:[%s2053_s29 + $0x60] sm:$0xff] %v1125_v41  ;;  %1231 = vst [vmem:[%s2053_s29 + $0x1d0] sm:$0xff] %v1171_v55  ;;  %v1055_v63 = vmax.f32 %v955_v56, -0.07819924  ;;  %v1410_v50 = vpop.f32.mrb[12].mxu1 }
 0x195   : > { %1186 = vst [vmem:[%s2053_s29 + $0x68] sm:$0xff] %v1126_v57  ;;  %v1118_v17 = vmin.f32 %v1058_v60, 0.8729542  ;;  %v799_v7 = vpop.f32.mrb[10].mxu0  ;;  %v970_v0 = vadd.f32 %v1410_v50, %v2086_v44  ;;  %v964_v2 = vpop.f32.mrb[13].mxu1 }
 0x196   : > { %v1115_v5 = vmin.f32 %v1055_v63, 0.8729542  ;;  %v800_v62 = vadd.f32 %v799_v7, %v2041_v59  ;;  %v801_v13 = vpop.f32.mrb[11].mxu0  ;;  %v965_v14 = vadd.f32 %v964_v2, %v2086_v44 }
 0x197   : > { %1178 = vst [vmem:[%s2053_s29 + $0x28] sm:$0xff] %v1118_v17  ;;  %v1064_v16 = vmax.f32 %v970_v0, -0.07819924  ;;  %v802_v19 = vadd.f32 %v801_v13, %v2044_v21 }
 0x198   : > { %1175 = vst [vmem:[%s2053_s29 + $0x10] sm:$0xff] %v1115_v5  ;;  %v1068_v61 = vmax.f32 %v800_v62, -0.07819924  ;;  %v1061_v24 = vmax.f32 %v965_v14, -0.07819924  ;;  %v1413_v11 = vpop.f32.mrb[14].mxu1 }
 0x199   : > { %v1124_v18 = vmin.f32 %v1064_v16, 0.8729542  ;;  %v1069_v8 = vmax.f32 %v802_v19, -0.07819924  ;;  %v980_v1 = vadd.f32 %v1413_v11, %v2086_v44  ;;  %v974_v25 = vpop.f32.mrb[15].mxu1 }
 0x19a   : > { %v1128_v27 = vmin.f32 %v1068_v61, 0.8729542  ;;  %v1121_v26 = vmin.f32 %v1061_v24, 0.8729542  ;;  %v805_v3 = vpop.f32.mrb[12].mxu0  ;;  %v975_v4 = vadd.f32 %v974_v25, %v2086_v44 }
 0x19b   : > { %1184 = vst [vmem:[%s2053_s29 + $0x58] sm:$0xff] %v1124_v18  ;;  %v1129_v10 = vmin.f32 %v1069_v8, 0.8729542  ;;  %v1070_v6 = vmax.f32 %v980_v1, -0.07819924  ;;  %v806_v9 = vadd.f32 %v805_v3, %v2041_v59  ;;  %v807_v32 = vpop.f32.mrb[13].mxu0 }
 0x19c   : > { %1188 = vst [vmem:[%s2053_s29 + $0x78] sm:$0xff] %v1128_v27  ;;  %1181 = vst [vmem:[%s2053_s29 + $0x40] sm:$0xff] %v1121_v26  ;;  %v1067_v22 = vmax.f32 %v975_v4, -0.07819924  ;;  %v808_v38 = vadd.f32 %v807_v32, %v2044_v21 }
 0x19d   : > { %1189 = vst [vmem:[%s2053_s29 + $0x80] sm:$0xff] %v1129_v10  ;;  %v1130_v39 = vmin.f32 %v1070_v6, 0.8729542  ;;  %v1071_v45 = vmax.f32 %v806_v9, -0.07819924 }
 0x19e   : > { %v1127_v30 = vmin.f32 %v1067_v22, 0.8729542  ;;  %v1072_v12 = vmax.f32 %v808_v38, -0.07819924 }
 0x19f   : > { %1190 = vst [vmem:[%s2053_s29 + $0x88] sm:$0xff] %v1130_v39  ;;  %v1131_v34 = vmin.f32 %v1071_v45, 0.8729542 }
 0x1a0   : > { %1187 = vst [vmem:[%s2053_s29 + $0x70] sm:$0xff] %v1127_v30  ;;  %v1132_v47 = vmin.f32 %v1072_v12, 0.8729542 }
 0x1a1   : > { %1191 = vst [vmem:[%s2053_s29 + $0x90] sm:$0xff] %v1131_v34  ;;  %v811_v28 = vpop.f32.mrb[14].mxu0  ;;  %v1416_v35 = vpop.f32.mrb[16].mxu1 }
 0x1a2   : > { %1192 = vst [vmem:[%s2053_s29 + $0x98] sm:$0xff] %v1132_v47  ;;  %v812_v36 = vadd.f32 %v811_v28, %v2041_v59  ;;  %v990_v37 = vadd.f32 %v1416_v35, %v2086_v44  ;;  %v813_v31 = vpop.f32.mrb[15].mxu0  ;;  %v984_v53 = vpop.f32.mrb[17].mxu1 }
 0x1a3   : > { %v814_v40 = vadd.f32 %v813_v31, %v2044_v21  ;;  %v985_v42 = vadd.f32 %v984_v53, %v2086_v44 }
 0x1a4   : > { %v1074_v43 = vmax.f32 %v812_v36, -0.07819924  ;;  %v1076_v46 = vmax.f32 %v990_v37, -0.07819924 }
 0x1a5   : > { %v1075_v33 = vmax.f32 %v814_v40, -0.07819924  ;;  %v1073_v48 = vmax.f32 %v985_v42, -0.07819924 }
 0x1a6   : > { %v1134_v20 = vmin.f32 %v1074_v43, 0.8729542  ;;  %v1136_v23 = vmin.f32 %v1076_v46, 0.8729542  ;;  %v817_v58 = vpop.f32.mrb[16].mxu0 }
 0x1a7   : > { %v1135_v15 = vmin.f32 %v1075_v33, 0.8729542  ;;  %v1133_v49 = vmin.f32 %v1073_v48, 0.8729542  ;;  %v818_v51 = vadd.f32 %v817_v58, %v2041_v59  ;;  %v819_v52 = vpop.f32.mrb[17].mxu0 }
 0x1a8   : > { %1194 = vst [vmem:[%s2053_s29 + $0xa8] sm:$0xff] %v1134_v20  ;;  %1196 = vst [vmem:[%s2053_s29 + $0xb8] sm:$0xff] %v1136_v23  ;;  %v820_v29 = vadd.f32 %v819_v52, %v2044_v21 }
 0x1a9   : > { %1195 = vst [vmem:[%s2053_s29 + $0xb0] sm:$0xff] %v1135_v15  ;;  %1193 = vst [vmem:[%s2053_s29 + $0xa0] sm:$0xff] %v1133_v49  ;;  %v1077_v54 = vmax.f32 %v818_v51, -0.07819924 }
 0x1aa   : > { %v1078_v41 = vmax.f32 %v820_v29, -0.07819924 }
 0x1ab   : > { %v1137_v55 = vmin.f32 %v1077_v54, 0.8729542 }
 0x1ac   : > { %v1138_v56 = vmin.f32 %v1078_v41, 0.8729542 }
 0x1ad   : > { %1197 = vst [vmem:[%s2053_s29 + $0xc0] sm:$0xff] %v1137_v55  ;;  %v823_v57 = vpop.f32.mrb[18].mxu0  ;;  %v1419_v60 = vpop.f32.mrb[18].mxu1 }
 0x1ae   : > { %1198 = vst [vmem:[%s2053_s29 + $0xc8] sm:$0xff] %v1138_v56  ;;  %v824_v63 = vadd.f32 %v823_v57, %v2041_v59  ;;  %v1000_v50 = vadd.f32 %v1419_v60, %v2086_v44  ;;  %v825_v17 = vpop.f32.mrb[19].mxu0  ;;  %v994_v7 = vpop.f32.mrb[19].mxu1 }
 0x1af   : > { %v826_v0 = vadd.f32 %v825_v17, %v2044_v21  ;;  %v995_v2 = vadd.f32 %v994_v7, %v2086_v44 }
 0x1b0   : > { %v1080_v5 = vmax.f32 %v824_v63, -0.07819924  ;;  %v1082_v62 = vmax.f32 %v1000_v50, -0.07819924 }
 0x1b1   : > { %v1081_v13 = vmax.f32 %v826_v0, -0.07819924  ;;  %v1079_v14 = vmax.f32 %v995_v2, -0.07819924 }
 0x1b2   : > { %v1140_v16 = vmin.f32 %v1080_v5, 0.8729542  ;;  %v1142_v19 = vmin.f32 %v1082_v62, 0.8729542 }
 0x1b3   : > { %v1141_v61 = vmin.f32 %v1081_v13, 0.8729542  ;;  %v1139_v24 = vmin.f32 %v1079_v14, 0.8729542 }
 0x1b4   : > { %1200 = vst [vmem:[%s2053_s29 + $0xd8] sm:$0xff] %v1140_v16  ;;  %1202 = vst [vmem:[%s2053_s29 + $0xe8] sm:$0xff] %v1142_v19  ;;  %v829_v11 = vpop.f32.mrb[20].mxu0 }
 0x1b5   : > { %1201 = vst [vmem:[%s2053_s29 + $0xe0] sm:$0xff] %v1141_v61  ;;  %1199 = vst [vmem:[%s2053_s29 + $0xd0] sm:$0xff] %v1139_v24  ;;  %v830_v18 = vadd.f32 %v829_v11, %v2041_v59  ;;  %v831_v8 = vpop.f32.mrb[21].mxu0 }
 0x1b6   : > { %v832_v1 = vadd.f32 %v831_v8, %v2044_v21 }
 0x1b7   : > { %v1083_v25 = vmax.f32 %v830_v18, -0.07819924 }
 0x1b8   : > { %v1084_v27 = vmax.f32 %v832_v1, -0.07819924 }
 0x1b9   : > { %v1143_v26 = vmin.f32 %v1083_v25, 0.8729542  ;;  %v835_v3 = vpop.f32.mrb[22].mxu0  ;;  %v1422_v4 = vpop.f32.mrb[20].mxu1 }
 0x1ba   : > { %v1144_v10 = vmin.f32 %v1084_v27, 0.8729542  ;;  %v836_v6 = vadd.f32 %v835_v3, %v2041_v59  ;;  %v1010_v9 = vadd.f32 %v1422_v4, %v2086_v44  ;;  %v837_v32 = vpop.f32.mrb[23].mxu0  ;;  %v1004_v22 = vpop.f32.mrb[21].mxu1 }
 0x1bb   : > { %1203 = vst [vmem:[%s2053_s29 + $0xf0] sm:$0xff] %v1143_v26  ;;  %v838_v38 = vadd.f32 %v837_v32, %v2044_v21  ;;  %v1005_v39 = vadd.f32 %v1004_v22, %v2086_v44 }
 0x1bc   : > { %1204 = vst [vmem:[%s2053_s29 + $0xf8] sm:$0xff] %v1144_v10  ;;  %v1086_v45 = vmax.f32 %v836_v6, -0.07819924  ;;  %v1088_v30 = vmax.f32 %v1010_v9, -0.07819924 }
 0x1bd   : > { %v1087_v12 = vmax.f32 %v838_v38, -0.07819924  ;;  %v1085_v34 = vmax.f32 %v1005_v39, -0.07819924 }
 0x1be   : > { %v1146_v47 = vmin.f32 %v1086_v45, 0.8729542  ;;  %v1148_v28 = vmin.f32 %v1088_v30, 0.8729542 }
 0x1bf   : > { %v1147_v35 = vmin.f32 %v1087_v12, 0.8729542  ;;  %v1145_v36 = vmin.f32 %v1085_v34, 0.8729542 }
 0x1c0   : > { %1206 = vst [vmem:[%s2053_s29 + $0x108] sm:$0xff] %v1146_v47  ;;  %1208 = vst [vmem:[%s2053_s29 + $0x118] sm:$0xff] %v1148_v28  ;;  %v841_v37 = vpop.f32.mrb[24].mxu0 }
 0x1c1   : > { %1207 = vst [vmem:[%s2053_s29 + $0x110] sm:$0xff] %v1147_v35  ;;  %1205 = vst [vmem:[%s2053_s29 + $0x100] sm:$0xff] %v1145_v36  ;;  %v842_v31 = vadd.f32 %v841_v37, %v2041_v59  ;;  %v843_v53 = vpop.f32.mrb[25].mxu0 }
 0x1c2   : > { %v844_v40 = vadd.f32 %v843_v53, %v2044_v21 }
 0x1c3   : > { %v1089_v42 = vmax.f32 %v842_v31, -0.07819924 }
 0x1c4   : > { %v1090_v43 = vmax.f32 %v844_v40, -0.07819924 }
 0x1c5   : > { %v1149_v46 = vmin.f32 %v1089_v42, 0.8729542  ;;  %v847_v33 = vpop.f32.mrb[26].mxu0  ;;  %v1425_v48 = vpop.f32.mrb[22].mxu1 }
 0x1c6   : > { %v1150_v20 = vmin.f32 %v1090_v43, 0.8729542  ;;  %v848_v23 = vadd.f32 %v847_v33, %v2041_v59  ;;  %v1020_v58 = vadd.f32 %v1425_v48, %v2086_v44  ;;  %v849_v15 = vpop.f32.mrb[27].mxu0  ;;  %v1014_v49 = vpop.f32.mrb[23].mxu1 }
 0x1c7   : > { %1209 = vst [vmem:[%s2053_s29 + $0x120] sm:$0xff] %v1149_v46  ;;  %v850_v51 = vadd.f32 %v849_v15, %v2044_v21  ;;  %v1015_v52 = vadd.f32 %v1014_v49, %v2086_v44 }
 0x1c8   : > { %1210 = vst [vmem:[%s2053_s29 + $0x128] sm:$0xff] %v1150_v20  ;;  %v1092_v29 = vmax.f32 %v848_v23, -0.07819924  ;;  %v1094_v54 = vmax.f32 %v1020_v58, -0.07819924 }
 0x1c9   : > { %v1093_v41 = vmax.f32 %v850_v51, -0.07819924  ;;  %v1091_v55 = vmax.f32 %v1015_v52, -0.07819924 }
 0x1ca   : > { %v1152_v56 = vmin.f32 %v1092_v29, 0.8729542  ;;  %v1154_v57 = vmin.f32 %v1094_v54, 0.8729542  ;;  %v853_v60 = vpop.f32.mrb[28].mxu0 }
 0x1cb   : > { %v1153_v63 = vmin.f32 %v1093_v41, 0.8729542  ;;  %v1151_v50 = vmin.f32 %v1091_v55, 0.8729542  ;;  %v854_v17 = vadd.f32 %v853_v60, %v2041_v59  ;;  %v855_v7 = vpop.f32.mrb[29].mxu0  ;;  %v1428_v0 = vpop.f32.mrb[24].mxu1 }
 0x1cc   : > { %1212 = vst [vmem:[%s2053_s29 + $0x138] sm:$0xff] %v1152_v56  ;;  %1214 = vst [vmem:[%s2053_s29 + $0x148] sm:$0xff] %v1154_v57  ;;  %v856_v2 = vadd.f32 %v855_v7, %v2044_v21  ;;  %v1030_v5 = vadd.f32 %v1428_v0, %v2086_v44  ;;  %v1024_v62 = vpop.f32.mrb[25].mxu1 }
 0x1cd   : > { %1213 = vst [vmem:[%s2053_s29 + $0x140] sm:$0xff] %v1153_v63  ;;  %1211 = vst [vmem:[%s2053_s29 + $0x130] sm:$0xff] %v1151_v50  ;;  %v1095_v13 = vmax.f32 %v854_v17, -0.07819924  ;;  %v1025_v14 = vadd.f32 %v1024_v62, %v2086_v44 }
 0x1ce   : > { %v1096_v16 = vmax.f32 %v856_v2, -0.07819924  ;;  %v1100_v59 = vmax.f32 %v1030_v5, -0.07819924 }
 0x1cf   : > { %v1155_v19 = vmin.f32 %v1095_v13, 0.8729542  ;;  %v1097_v61 = vmax.f32 %v1025_v14, -0.07819924  ;;  %v1431_v24 = vpop.f32.mrb[26].mxu1 }
 0x1d0   : > { %v1156_v11 = vmin.f32 %v1096_v16, 0.8729542  ;;  %v1160_v18 = vmin.f32 %v1100_v59, 0.8729542  ;;  %v1040_v21 = vadd.f32 %v1431_v24, %v2086_v44  ;;  %v1034_v8 = vpop.f32.mrb[27].mxu1 }
 0x1d1   : > { %1215 = vst [vmem:[%s2053_s29 + $0x150] sm:$0xff] %v1155_v19  ;;  %v1157_v1 = vmin.f32 %v1097_v61, 0.8729542  ;;  %v1035_v25 = vadd.f32 %v1034_v8, %v2086_v44 }
 0x1d2   : > { %1216 = vst [vmem:[%s2053_s29 + $0x158] sm:$0xff] %v1156_v11  ;;  %1220 = vst [vmem:[%s2053_s29 + $0x178] sm:$0xff] %v1160_v18  ;;  %v1106_v27 = vmax.f32 %v1040_v21, -0.07819924 }
 0x1d3   : > { %1217 = vst [vmem:[%s2053_s29 + $0x160] sm:$0xff] %v1157_v1  ;;  %v1103_v26 = vmax.f32 %v1035_v25, -0.07819924  ;;  %v1434_v3 = vpop.f32.mrb[28].mxu1 }
 0x1d4   : > { %v1166_v4 = vmin.f32 %v1106_v27, 0.8729542  ;;  %v1050_v10 = vadd.f32 %v1434_v3, %v2086_v44  ;;  %v1044_v6 = vpop.f32.mrb[29].mxu1 }
 0x1d5   : > { %v1163_v9 = vmin.f32 %v1103_v26, 0.8729542  ;;  %v1045_v32 = vadd.f32 %v1044_v6, %v2086_v44 }
 0x1d6   : > { %1226 = vst [vmem:[%s2053_s29 + $0x1a8] sm:$0xff] %v1166_v4  ;;  %v1112_v22 = vmax.f32 %v1050_v10, -0.07819924 }
 0x1d7   : > { %1223 = vst [vmem:[%s2053_s29 + $0x190] sm:$0xff] %v1163_v9  ;;  %v1109_v38 = vmax.f32 %v1045_v32, -0.07819924 }
 0x1d8   : > { %v1172_v39 = vmin.f32 %v1112_v22, 0.8729542 }
 0x1d9   : > { %v1169_v45 = vmin.f32 %v1109_v38, 0.8729542 }
 0x1da   : > { %1232 = vst [vmem:[%s2053_s29 + $0x1d8] sm:$0xff] %v1172_v39 }
 0x1db   : > { %1229 = vst [vmem:[%s2053_s29 + $0x1c0] sm:$0xff] %v1169_v45 }
 0x1dc PF: > { %s13_s14 = sadd.s32 1, %s1506_s14   ;;  %s2188_s12 = smov %s1502_s13 }
 0x1dd   : > { %p10_p5 = scmp.ge.s32.totalorder %s13_s14, 4   ;;  %s2189_s13 = smov %s2191_s15 }
 0x1df   :  { %12 = sbr.rel (!%p10_p5) target bundleno = 2 (0x2), region = 63 }

</bundles_post_ra>
